<compile_context>
chip_gen: v5e
topology: v5e:2x2
jax: 0.10.0
libtpu: 0.0.40
codegen_flags: <defaults>
</compile_context>

<pallas_src>
import functools
import math

import jax
import jax.numpy as jnp
from jax import lax
from jax.experimental import pallas as pl
from jax.experimental.pallas import tpu as pltpu


def _mha_kernel(x_ref, wqkv_ref, bqkv_ref, wo_ref, bo_ref, o_ref,
                kv_ref, head_ref, *, num_heads, head_dim, q_tile,
                seq_pad, seq_valid):
    """One (batch, query-tile) grid point.

    VMEM blocks / scratch seen by the kernel:
      x_ref    : (1, S, E)   bf16  full sequence for this batch (fetched once)
      wqkv_ref : (E, 3E)     bf16  fused [Wq^T*scale | Wk^T | Wv^T]
      bqkv_ref : (1, 3E)     f32   fused [bq*scale | bk | bv]
      wo_ref   : (E, E)      bf16  Wo^T
      bo_ref   : (1, E)      f32
      o_ref    : (1, TQ, E)  f32
      kv_ref   : (S, 2E)     bf16  cached [K | V], persists across query tiles
      head_ref : (TQ, E)     bf16  per-head outputs streamed in, fc_out input
    """
    E = num_heads * head_dim
    qi = pl.program_id(1)

    # ---- K/V projection: computed ONCE per batch (qi == 0), cached in VMEM --
    @pl.when(qi == 0)
    def _():
        kv = jnp.dot(x_ref[0], wqkv_ref[:, E:],
                     preferred_element_type=jnp.float32) + bqkv_ref[:, E:]
        kv_ref[...] = kv.astype(jnp.bfloat16)

    # ---- Q projection for this query tile only (scale folded into weights) --
    q_start = pl.multiple_of(qi * q_tile, q_tile)
    xq = x_ref[0, pl.ds(q_start, q_tile), :]                      # (TQ, E) bf16
    q = jnp.dot(xq, wqkv_ref[:, :E],
                preferred_element_type=jnp.float32) + bqkv_ref[:, :E]
    q = q.astype(jnp.bfloat16)                                    # (TQ, E)

    if seq_pad > seq_valid:
        # Mask padded key columns (computed once, reused by every head).
        key_valid = lax.broadcasted_iota(jnp.int32, (q_tile, seq_pad), 1) < seq_valid

    for h in range(num_heads):                 # static unroll, H is small
        lo, hi = h * head_dim, (h + 1) * head_dim
        qh = q[:, lo:hi]                       # (TQ, D) bf16
        kh = kv_ref[:, lo:hi]                  # (S,  D) bf16
        vh = kv_ref[:, E + lo:E + hi]          # (S,  D) bf16

        # scores = qh @ kh^T without materializing a transpose.
        s = lax.dot_general(qh, kh,
                            dimension_numbers=(((1,), (1,)), ((), ())),
                            preferred_element_type=jnp.float32)   # (TQ, S)
        if seq_pad > seq_valid:
            s = jnp.where(key_valid, s, -1e30)

        # Numerically stable softmax in f32; normalization deferred past P@V.
        m = jnp.max(s, axis=-1, keepdims=True)
        e = jnp.exp(s - m)
        denom = jnp.sum(e, axis=-1, keepdims=True)
        pv = jnp.dot(e.astype(jnp.bfloat16), vh,
                     preferred_element_type=jnp.float32)          # (TQ, D)
        pv = pv * pl.reciprocal(denom, approx=True)
        head_ref[:, lo:hi] = pv.astype(jnp.bfloat16)              # stream out

    out = jnp.dot(head_ref[...], wo_ref[...],
                  preferred_element_type=jnp.float32) + bo_ref[...]
    o_ref[...] = out[None, :, :].astype(o_ref.dtype)


def _pick_q_tile(seq_pad):
    for t in (512, 256, 128):      # cap TQ at 512
        if seq_pad % t == 0:
            return t
    return seq_pad                 # only reached when seq_pad < 128


def _vmem_limit_bytes(seq_pad, embed_dim, q_tile):
    bf16, f32 = 2, 4
    est = (2 * seq_pad * embed_dim * bf16           # x block (double-buffered)
           + 2 * 4 * embed_dim * embed_dim * bf16   # fused weights (2 bufs)
           + 2 * 4 * embed_dim * f32                # biases
           + 2 * q_tile * embed_dim * f32           # output block
           + seq_pad * 2 * embed_dim * bf16         # kv scratch
           + q_tile * embed_dim * bf16              # head scratch
           + 4 * q_tile * seq_pad * f32             # scores / exp working set
           + 8 * q_tile * embed_dim * f32)          # q / misc working set
    # Clamp to 64 MiB: within v7x physical VMEM, plenty of headroom on v5e/v6e.
    return min(max(32 * 1024 * 1024, int(est * 1.5)), 64 * 1024 * 1024)


def multi_head_attention_pallas(x, params, num_heads):
    """x: (B, S, E) float32; params: torch-layout (W, b) for q/k/v/fc_out."""
    wq, bq, wk, bk, wv, bv, wo, bo = params
    B, S, E = x.shape
    assert E % num_heads == 0, "embed_dim must be divisible by num_heads"
    D = E // num_heads

    # Pad S to a multiple of 128 (when S >= 128) so tiles stay lane/sublane
    # aligned; padded keys are masked inside the kernel.
    if S >= 128 and S % 128 != 0:
        S_pad = ((S + 127) // 128) * 128
    else:
        S_pad = S
    if S_pad != S:
        x = jnp.pad(x, ((0, 0), (0, S_pad - S), (0, 0)))

    # Fuse the three projections into one (E, 3E) weight (pre-transposed so the
    # kernel does x @ W); fold 1/sqrt(D) into the Q columns + bias; bf16 MXU
    # weights, f32 biases.
    scale = 1.0 / math.sqrt(D)
    w_qkv = jnp.concatenate([wq.T * scale, wk.T, wv.T], axis=1).astype(jnp.bfloat16)
    b_qkv = jnp.concatenate([bq * scale, bk, bv]).reshape(1, 3 * E).astype(jnp.float32)
    wo_t = wo.T.astype(jnp.bfloat16)                      # (E, E)
    bo_r = bo.reshape(1, E).astype(jnp.float32)

    x_bf = x.astype(jnp.bfloat16)                         # ship x once, as bf16

    TQ = _pick_q_tile(S_pad)
    grid = (B, S_pad // TQ)
    # TODO(synk): if B == 1 on v7x, split the query-tile range across a leading
    #             parallel axis so both TensorCores get work.

    kernel = functools.partial(_mha_kernel, num_heads=num_heads, head_dim=D,
                               q_tile=TQ, seq_pad=S_pad, seq_valid=S)

    out = pl.pallas_call(
        kernel,
        out_shape=jax.ShapeDtypeStruct((B, S_pad, E), jnp.float32),
        grid_spec=pltpu.PrefetchScalarGridSpec(
            num_scalar_prefetch=0,
            grid=grid,
            in_specs=[
                pl.BlockSpec((1, S_pad, E), lambda b, qi: (b, 0, 0)),   # x (full seq)
                pl.BlockSpec((E, 3 * E), lambda b, qi: (0, 0)),         # fused Wqkv^T
                pl.BlockSpec((1, 3 * E), lambda b, qi: (0, 0)),         # fused bias
                pl.BlockSpec((E, E), lambda b, qi: (0, 0)),             # Wo^T
                pl.BlockSpec((1, E), lambda b, qi: (0, 0)),             # bo
            ],
            out_specs=pl.BlockSpec((1, TQ, E), lambda b, qi: (b, qi, 0)),
            scratch_shapes=[
                pltpu.VMEM((S_pad, 2 * E), jnp.bfloat16),   # cached [K | V]
                pltpu.VMEM((TQ, E), jnp.bfloat16),          # per-head outputs
            ],
        ),
        compiler_params=pltpu.CompilerParams(
            dimension_semantics=("parallel", "arbitrary"),
            vmem_limit_bytes=_vmem_limit_bytes(S_pad, E, TQ),
        ),
    )(x_bf, w_qkv, b_qkv, wo_t, bo_r)

    if S_pad != S:
        out = out[:, :S, :]
    return out


def multi_head_attention_ref(x, params, num_heads):
    """Pure-JAX f32 reference mirroring the PyTorch forward."""
    wq, bq, wk, bk, wv, bv, wo, bo = params
    B, S, E = x.shape
    H = num_heads
    D = E // H

    def lin(t, w, b):
        return t @ w.T + b

    def split_heads(t):
        return jnp.transpose(t.reshape(B, S, H, D), (0, 2, 1, 3))  # (B,H,S,D)

    Q = split_heads(lin(x, wq, bq))
    K = split_heads(lin(x, wk, bk))
    V = split_heads(lin(x, wv, bv))
    attn = jnp.einsum("bhsd,bhtd->bhst", Q, K) / (D ** 0.5)
    attn = jax.nn.softmax(attn, axis=-1)
    out = jnp.einsum("bhst,bhtd->bhsd", attn, V)
    out = jnp.transpose(out, (0, 2, 1, 3)).reshape(B, S, E)
    return lin(out, wo, bo)


if __name__ == "__main__":
    def make_params(key, E):
        keys = jax.random.split(key, 8)
        s = 1.0 / jnp.sqrt(jnp.float32(E))

        def u(k, shape):
            return jax.random.uniform(k, shape, jnp.float32, -s, s)

        return (u(keys[0], (E, E)), u(keys[1], (E,)),   # query
                u(keys[2], (E, E)), u(keys[3], (E,)),   # key
                u(keys[4], (E, E)), u(keys[5], (E,)),   # value
                u(keys[6], (E, E)), u(keys[7], (E,)))   # fc_out

    root = jax.random.PRNGKey(0)
    cases = [
        (2, 8, 32, 4),      # tiny: block == full array path
        (2, 256, 128, 4),   # multiple query tiles -> exercises the KV cache
        (1, 200, 128, 4),   # ragged S -> padding + key masking path
    ]
    for i, (B, S, E, H) in enumerate(cases):
        kp, kx = jax.random.split(jax.random.fold_in(root, i))
        params = make_params(kp, E)
        x = jax.random.normal(kx, (B, S, E), jnp.float32)

        out = jax.block_until_ready(multi_head_attention_pallas(x, params, H))
        ref = multi_head_attention_ref(x, params, H)

        assert out.shape == ref.shape, f"shape mismatch in case {i}"
        # bf16 MXU operands (f32 accumulation) + approx reciprocal softmax =>
        # relaxed tolerance vs the f32 reference.
        assert jnp.allclose(out, ref, atol=5e-2, rtol=5e-2), f"mismatch vs reference (case {i})"

    print("KERNEL_OK")
</pallas_src>

<mosaic_0001>
module attributes {stable_mosaic.version = 11 : i64} {
  func.func @_mha_kernel(%arg0: i32, %arg1: i32, %arg2: memref<1x8x32xbf16, #tpu.memory_space<vmem>>, %arg3: memref<32x96xbf16, #tpu.memory_space<vmem>>, %arg4: memref<1x96xf32, #tpu.memory_space<vmem>>, %arg5: memref<32x32xbf16, #tpu.memory_space<vmem>>, %arg6: memref<1x32xf32, #tpu.memory_space<vmem>>, %arg7: memref<1x8x32xf32, #tpu.memory_space<vmem>>, %arg8: memref<8x64xbf16, #tpu.memory_space<vmem>>, %arg9: memref<8x32xbf16, #tpu.memory_space<vmem>>) attributes {dimension_semantics = [#tpu.dimension_semantics<parallel>, #tpu.dimension_semantics<arbitrary>], iteration_bounds = array<i64: 2, 1>, scalar_prefetch = 0 : i64, scratch_operands = 2 : i64, tpu.core_type = #tpu.core_type<tc>, window_params = [{transform_indices = @transform_0, window_bounds = array<i64: 1, 8, 32>}, {pipeline_mode = #tpu.pipeline_mode<synchronous>, transform_indices = @transform_1, window_bounds = array<i64: 32, 96>}, {pipeline_mode = #tpu.pipeline_mode<synchronous>, transform_indices = @transform_2, window_bounds = array<i64: 1, 96>}, {pipeline_mode = #tpu.pipeline_mode<synchronous>, transform_indices = @transform_3, window_bounds = array<i64: 32, 32>}, {pipeline_mode = #tpu.pipeline_mode<synchronous>, transform_indices = @transform_4, window_bounds = array<i64: 1, 32>}, {transform_indices = @transform_5, window_bounds = array<i64: 1, 8, 32>}]} {
    %c0_i32 = arith.constant 0 : i32
    %0 = arith.cmpi eq, %arg1, %c0_i32 : i32
    %1 = arith.extui %0 : i1 to i32
    %c0_i32_0 = arith.constant 0 : i32
    %2 = arith.cmpi ne, %1, %c0_i32_0 : i32
    scf.if %2 {
      %c0_49 = arith.constant 0 : index
      %c0_50 = arith.constant 0 : index
      %c0_51 = arith.constant 0 : index
      %94 = vector.load %arg2[%c0_49, %c0_50, %c0_51] : memref<1x8x32xbf16, #tpu.memory_space<vmem>>, vector<1x8x32xbf16>
      %95 = vector.shape_cast %94 : vector<1x8x32xbf16> to vector<8x32xbf16>
      %c0_52 = arith.constant 0 : index
      %c32_53 = arith.constant 32 : index
      %96 = vector.load %arg3[%c0_52, %c32_53] : memref<32x96xbf16, #tpu.memory_space<vmem>>, vector<32x64xbf16>
      %cst_54 = arith.constant dense<0.000000e+00> : vector<8x64xf32>
      %97 = tpu.matmul %95, %96, %cst_54 {dimension_numbers = #tpu.dot_dimension_numbers<[1], [0], [0], [1], [0, 0, 1, 1], [], []>} : vector<8x32xbf16>, vector<32x64xbf16>, vector<8x64xf32> -> vector<8x64xf32>
      %c0_55 = arith.constant 0 : index
      %c32_56 = arith.constant 32 : index
      %98 = vector.load %arg4[%c0_55, %c32_56] : memref<1x96xf32, #tpu.memory_space<vmem>>, vector<1x64xf32>
      %99 = vector.broadcast %98 : vector<1x64xf32> to vector<8x64xf32>
      %100 = arith.addf %97, %99 : vector<8x64xf32>
      %101 = arith.truncf %100 : vector<8x64xf32> to vector<8x64xbf16>
      %c0_57 = arith.constant 0 : index
      %c0_58 = arith.constant 0 : index
      %102 = vector.load %arg8[%c0_57, %c0_58] : memref<8x64xbf16, #tpu.memory_space<vmem>>, vector<8x64xbf16>
      tpu.vector_store %arg8[%c0_57, %c0_58], %101 {strides = array<i32>} : memref<8x64xbf16, #tpu.memory_space<vmem>>, vector<8x64xbf16>,
    } else {
    }
    %c8_i32 = arith.constant 8 : i32
    %3 = arith.muli %arg1, %c8_i32 : i32
    %4 = tpu.assume_multiple %3, 8 : i32
    %c0 = arith.constant 0 : index
    %5 = arith.index_cast %4 : i32 to index
    %c0_1 = arith.constant 0 : index
    %6 = vector.load %arg2[%c0, %5, %c0_1] : memref<1x8x32xbf16, #tpu.memory_space<vmem>>, vector<1x8x32xbf16>
    %7 = vector.shape_cast %6 : vector<1x8x32xbf16> to vector<8x32xbf16>
    %c0_2 = arith.constant 0 : index
    %c0_3 = arith.constant 0 : index
    %8 = vector.load %arg3[%c0_2, %c0_3] : memref<32x96xbf16, #tpu.memory_space<vmem>>, vector<32x32xbf16>
    %cst = arith.constant dense<0.000000e+00> : vector<8x32xf32>
    %9 = tpu.matmul %7, %8, %cst {dimension_numbers = #tpu.dot_dimension_numbers<[1], [0], [0], [1], [0, 0, 1, 1], [], []>} : vector<8x32xbf16>, vector<32x32xbf16>, vector<8x32xf32> -> vector<8x32xf32>
    %c0_4 = arith.constant 0 : index
    %c0_5 = arith.constant 0 : index
    %10 = vector.load %arg4[%c0_4, %c0_5] : memref<1x96xf32, #tpu.memory_space<vmem>>, vector<1x32xf32>
    %11 = vector.broadcast %10 : vector<1x32xf32> to vector<8x32xf32>
    %12 = arith.addf %9, %11 : vector<8x32xf32>
    %13 = arith.truncf %12 : vector<8x32xf32> to vector<8x32xbf16>
    %14 = vector.extract_strided_slice %13 {offsets = [0, 0], sizes = [8, 8], strides = [1, 1]} : vector<8x32xbf16> to vector<8x8xbf16>
    %c0_6 = arith.constant 0 : index
    %c0_7 = arith.constant 0 : index
    %15 = vector.load %arg8[%c0_6, %c0_7] : memref<8x64xbf16, #tpu.memory_space<vmem>>, vector<8x8xbf16>
    %c0_8 = arith.constant 0 : index
    %c32 = arith.constant 32 : index
    %16 = vector.load %arg8[%c0_8, %c32] : memref<8x64xbf16, #tpu.memory_space<vmem>>, vector<8x8xbf16>
    %cst_9 = arith.constant dense<0.000000e+00> : vector<8x8xf32>
    %17 = tpu.matmul %14, %15, %cst_9 {dimension_numbers = #tpu.dot_dimension_numbers<[1], [1], [0], [0], [0, 0, 1, 0], [], []>} : vector<8x8xbf16>, vector<8x8xbf16>, vector<8x8xf32> -> vector<8x8xf32>
    %cst_10 = arith.constant dense<0xFF800000> : vector<8xf32>
    %18 = vector.multi_reduction <maximumf>, %17, %cst_10 [1] : vector<8x8xf32> to vector<8xf32>
    %19 = vector.shape_cast %18 : vector<8xf32> to vector<8x1xf32>
    %20 = vector.broadcast %19 : vector<8x1xf32> to vector<8x8xf32>
    %21 = arith.subf %17, %20 : vector<8x8xf32>
    %22 = math.exp %21 : vector<8x8xf32>
    %cst_11 = arith.constant dense<0.000000e+00> : vector<8xf32>
    %23 = vector.multi_reduction <add>, %22, %cst_11 [1] : vector<8x8xf32> to vector<8xf32>
    %24 = vector.shape_cast %23 : vector<8xf32> to vector<8x1xf32>
    %25 = arith.truncf %22 : vector<8x8xf32> to vector<8x8xbf16>
    %cst_12 = arith.constant dense<0.000000e+00> : vector<8x8xf32>
    %26 = tpu.matmul %25, %16, %cst_12 {dimension_numbers = #tpu.dot_dimension_numbers<[1], [0], [0], [1], [0, 0, 1, 1], [], []>} : vector<8x8xbf16>, vector<8x8xbf16>, vector<8x8xf32> -> vector<8x8xf32>
    %27 = tpu.reciprocal %24 {approx = true} : vector<8x1xf32> -> vector<8x1xf32>
    %28 = vector.broadcast %27 : vector<8x1xf32> to vector<8x8xf32>
    %29 = arith.mulf %26, %28 : vector<8x8xf32>
    %30 = arith.truncf %29 : vector<8x8xf32> to vector<8x8xbf16>
    %c0_13 = arith.constant 0 : index
    %c0_14 = arith.constant 0 : index
    %31 = vector.load %arg9[%c0_13, %c0_14] : memref<8x32xbf16, #tpu.memory_space<vmem>>, vector<8x8xbf16>
    tpu.vector_store %arg9[%c0_13, %c0_14], %30 {strides = array<i32>} : memref<8x32xbf16, #tpu.memory_space<vmem>>, vector<8x8xbf16>,
    %32 = vector.extract_strided_slice %13 {offsets = [0, 8], sizes = [8, 8], strides = [1, 1]} : vector<8x32xbf16> to vector<8x8xbf16>
    %c0_15 = arith.constant 0 : index
    %c8 = arith.constant 8 : index
    %33 = vector.load %arg8[%c0_15, %c8] : memref<8x64xbf16, #tpu.memory_space<vmem>>, vector<8x8xbf16>
    %c0_16 = arith.constant 0 : index
    %c40 = arith.constant 40 : index
    %34 = vector.load %arg8[%c0_16, %c40] : memref<8x64xbf16, #tpu.memory_space<vmem>>, vector<8x8xbf16>
    %cst_17 = arith.constant dense<0.000000e+00> : vector<8x8xf32>
    %35 = tpu.matmul %32, %33, %cst_17 {dimension_numbers = #tpu.dot_dimension_numbers<[1], [1], [0], [0], [0, 0, 1, 0], [], []>} : vector<8x8xbf16>, vector<8x8xbf16>, vector<8x8xf32> -> vector<8x8xf32>
    %cst_18 = arith.constant dense<0xFF800000> : vector<8xf32>
    %36 = vector.multi_reduction <maximumf>, %35, %cst_18 [1] : vector<8x8xf32> to vector<8xf32>
    %37 = vector.shape_cast %36 : vector<8xf32> to vector<8x1xf32>
    %38 = vector.broadcast %37 : vector<8x1xf32> to vector<8x8xf32>
    %39 = arith.subf %35, %38 : vector<8x8xf32>
    %40 = math.exp %39 : vector<8x8xf32>
    %cst_19 = arith.constant dense<0.000000e+00> : vector<8xf32>
    %41 = vector.multi_reduction <add>, %40, %cst_19 [1] : vector<8x8xf32> to vector<8xf32>
    %42 = vector.shape_cast %41 : vector<8xf32> to vector<8x1xf32>
    %43 = arith.truncf %40 : vector<8x8xf32> to vector<8x8xbf16>
    %cst_20 = arith.constant dense<0.000000e+00> : vector<8x8xf32>
    %44 = tpu.matmul %43, %34, %cst_20 {dimension_numbers = #tpu.dot_dimension_numbers<[1], [0], [0], [1], [0, 0, 1, 1], [], []>} : vector<8x8xbf16>, vector<8x8xbf16>, vector<8x8xf32> -> vector<8x8xf32>
    %45 = tpu.reciprocal %42 {approx = true} : vector<8x1xf32> -> vector<8x1xf32>
    %46 = vector.broadcast %45 : vector<8x1xf32> to vector<8x8xf32>
    %47 = arith.mulf %44, %46 : vector<8x8xf32>
    %48 = arith.truncf %47 : vector<8x8xf32> to vector<8x8xbf16>
    %c0_21 = arith.constant 0 : index
    %c8_22 = arith.constant 8 : index
    %49 = vector.load %arg9[%c0_21, %c8_22] : memref<8x32xbf16, #tpu.memory_space<vmem>>, vector<8x8xbf16>
    tpu.vector_store %arg9[%c0_21, %c8_22], %48 {strides = array<i32>} : memref<8x32xbf16, #tpu.memory_space<vmem>>, vector<8x8xbf16>,
    %50 = vector.extract_strided_slice %13 {offsets = [0, 16], sizes = [8, 8], strides = [1, 1]} : vector<8x32xbf16> to vector<8x8xbf16>
    %c0_23 = arith.constant 0 : index
    %c16 = arith.constant 16 : index
    %51 = vector.load %arg8[%c0_23, %c16] : memref<8x64xbf16, #tpu.memory_space<vmem>>, vector<8x8xbf16>
    %c0_24 = arith.constant 0 : index
    %c48 = arith.constant 48 : index
    %52 = vector.load %arg8[%c0_24, %c48] : memref<8x64xbf16, #tpu.memory_space<vmem>>, vector<8x8xbf16>
    %cst_25 = arith.constant dense<0.000000e+00> : vector<8x8xf32>
    %53 = tpu.matmul %50, %51, %cst_25 {dimension_numbers = #tpu.dot_dimension_numbers<[1], [1], [0], [0], [0, 0, 1, 0], [], []>} : vector<8x8xbf16>, vector<8x8xbf16>, vector<8x8xf32> -> vector<8x8xf32>
    %cst_26 = arith.constant dense<0xFF800000> : vector<8xf32>
    %54 = vector.multi_reduction <maximumf>, %53, %cst_26 [1] : vector<8x8xf32> to vector<8xf32>
    %55 = vector.shape_cast %54 : vector<8xf32> to vector<8x1xf32>
    %56 = vector.broadcast %55 : vector<8x1xf32> to vector<8x8xf32>
    %57 = arith.subf %53, %56 : vector<8x8xf32>
    %58 = math.exp %57 : vector<8x8xf32>
    %cst_27 = arith.constant dense<0.000000e+00> : vector<8xf32>
    %59 = vector.multi_reduction <add>, %58, %cst_27 [1] : vector<8x8xf32> to vector<8xf32>
    %60 = vector.shape_cast %59 : vector<8xf32> to vector<8x1xf32>
    %61 = arith.truncf %58 : vector<8x8xf32> to vector<8x8xbf16>
    %cst_28 = arith.constant dense<0.000000e+00> : vector<8x8xf32>
    %62 = tpu.matmul %61, %52, %cst_28 {dimension_numbers = #tpu.dot_dimension_numbers<[1], [0], [0], [1], [0, 0, 1, 1], [], []>} : vector<8x8xbf16>, vector<8x8xbf16>, vector<8x8xf32> -> vector<8x8xf32>
    %63 = tpu.reciprocal %60 {approx = true} : vector<8x1xf32> -> vector<8x1xf32>
    %64 = vector.broadcast %63 : vector<8x1xf32> to vector<8x8xf32>
    %65 = arith.mulf %62, %64 : vector<8x8xf32>
    %66 = arith.truncf %65 : vector<8x8xf32> to vector<8x8xbf16>
    %c0_29 = arith.constant 0 : index
    %c16_30 = arith.constant 16 : index
    %67 = vector.load %arg9[%c0_29, %c16_30] : memref<8x32xbf16, #tpu.memory_space<vmem>>, vector<8x8xbf16>
    tpu.vector_store %arg9[%c0_29, %c16_30], %66 {strides = array<i32>} : memref<8x32xbf16, #tpu.memory_space<vmem>>, vector<8x8xbf16>,
    %68 = vector.extract_strided_slice %13 {offsets = [0, 24], sizes = [8, 8], strides = [1, 1]} : vector<8x32xbf16> to vector<8x8xbf16>
    %c0_31 = arith.constant 0 : index
    %c24 = arith.constant 24 : index
    %69 = vector.load %arg8[%c0_31, %c24] : memref<8x64xbf16, #tpu.memory_space<vmem>>, vector<8x8xbf16>
    %c0_32 = arith.constant 0 : index
    %c56 = arith.constant 56 : index
    %70 = vector.load %arg8[%c0_32, %c56] : memref<8x64xbf16, #tpu.memory_space<vmem>>, vector<8x8xbf16>
    %cst_33 = arith.constant dense<0.000000e+00> : vector<8x8xf32>
    %71 = tpu.matmul %68, %69, %cst_33 {dimension_numbers = #tpu.dot_dimension_numbers<[1], [1], [0], [0], [0, 0, 1, 0], [], []>} : vector<8x8xbf16>, vector<8x8xbf16>, vector<8x8xf32> -> vector<8x8xf32>
    %cst_34 = arith.constant dense<0xFF800000> : vector<8xf32>
    %72 = vector.multi_reduction <maximumf>, %71, %cst_34 [1] : vector<8x8xf32> to vector<8xf32>
    %73 = vector.shape_cast %72 : vector<8xf32> to vector<8x1xf32>
    %74 = vector.broadcast %73 : vector<8x1xf32> to vector<8x8xf32>
    %75 = arith.subf %71, %74 : vector<8x8xf32>
    %76 = math.exp %75 : vector<8x8xf32>
    %cst_35 = arith.constant dense<0.000000e+00> : vector<8xf32>
    %77 = vector.multi_reduction <add>, %76, %cst_35 [1] : vector<8x8xf32> to vector<8xf32>
    %78 = vector.shape_cast %77 : vector<8xf32> to vector<8x1xf32>
    %79 = arith.truncf %76 : vector<8x8xf32> to vector<8x8xbf16>
    %cst_36 = arith.constant dense<0.000000e+00> : vector<8x8xf32>
    %80 = tpu.matmul %79, %70, %cst_36 {dimension_numbers = #tpu.dot_dimension_numbers<[1], [0], [0], [1], [0, 0, 1, 1], [], []>} : vector<8x8xbf16>, vector<8x8xbf16>, vector<8x8xf32> -> vector<8x8xf32>
    %81 = tpu.reciprocal %78 {approx = true} : vector<8x1xf32> -> vector<8x1xf32>
    %82 = vector.broadcast %81 : vector<8x1xf32> to vector<8x8xf32>
    %83 = arith.mulf %80, %82 : vector<8x8xf32>
    %84 = arith.truncf %83 : vector<8x8xf32> to vector<8x8xbf16>
    %c0_37 = arith.constant 0 : index
    %c24_38 = arith.constant 24 : index
    %85 = vector.load %arg9[%c0_37, %c24_38] : memref<8x32xbf16, #tpu.memory_space<vmem>>, vector<8x8xbf16>
    tpu.vector_store %arg9[%c0_37, %c24_38], %84 {strides = array<i32>} : memref<8x32xbf16, #tpu.memory_space<vmem>>, vector<8x8xbf16>,
    %c0_39 = arith.constant 0 : index
    %c0_40 = arith.constant 0 : index
    %86 = vector.load %arg9[%c0_39, %c0_40] : memref<8x32xbf16, #tpu.memory_space<vmem>>, vector<8x32xbf16>
    %c0_41 = arith.constant 0 : index
    %c0_42 = arith.constant 0 : index
    %87 = vector.load %arg5[%c0_41, %c0_42] : memref<32x32xbf16, #tpu.memory_space<vmem>>, vector<32x32xbf16>
    %cst_43 = arith.constant dense<0.000000e+00> : vector<8x32xf32>
    %88 = tpu.matmul %86, %87, %cst_43 {dimension_numbers = #tpu.dot_dimension_numbers<[1], [0], [0], [1], [0, 0, 1, 1], [], []>} : vector<8x32xbf16>, vector<32x32xbf16>, vector<8x32xf32> -> vector<8x32xf32>
    %c0_44 = arith.constant 0 : index
    %c0_45 = arith.constant 0 : index
    %89 = vector.load %arg6[%c0_44, %c0_45] : memref<1x32xf32, #tpu.memory_space<vmem>>, vector<1x32xf32>
    %90 = vector.broadcast %89 : vector<1x32xf32> to vector<8x32xf32>
    %91 = arith.addf %88, %90 : vector<8x32xf32>
    %92 = vector.shape_cast %91 : vector<8x32xf32> to vector<1x8x32xf32>
    %c0_46 = arith.constant 0 : index
    %c0_47 = arith.constant 0 : index
    %c0_48 = arith.constant 0 : index
    %93 = vector.load %arg7[%c0_46, %c0_47, %c0_48] : memref<1x8x32xf32, #tpu.memory_space<vmem>>, vector<1x8x32xf32>
    tpu.vector_store %arg7[%c0_46, %c0_47, %c0_48], %92 {strides = array<i32>} : memref<1x8x32xf32, #tpu.memory_space<vmem>>, vector<1x8x32xf32>,
    return
  }
  func.func @transform_0(%arg0: i32, %arg1: i32) -> (i32, i32, i32) {
    %c0_i32 = arith.constant 0 : i32
    %c0_i32_0 = arith.constant 0 : i32
    %c0_i32_1 = arith.constant 0 : i32
    return %arg0, %c0_i32, %c0_i32_0 : i32, i32, i32
  }
  func.func @transform_1(%arg0: i32, %arg1: i32) -> (i32, i32) {
    %c0_i32 = arith.constant 0 : i32
    %c0_i32_0 = arith.constant 0 : i32
    %c0_i32_1 = arith.constant 0 : i32
    return %c0_i32, %c0_i32_0 : i32, i32
  }
  func.func @transform_2(%arg0: i32, %arg1: i32) -> (i32, i32) {
    %c0_i32 = arith.constant 0 : i32
    %c0_i32_0 = arith.constant 0 : i32
    %c0_i32_1 = arith.constant 0 : i32
    return %c0_i32, %c0_i32_0 : i32, i32
  }
  func.func @transform_3(%arg0: i32, %arg1: i32) -> (i32, i32) {
    %c0_i32 = arith.constant 0 : i32
    %c0_i32_0 = arith.constant 0 : i32
    %c0_i32_1 = arith.constant 0 : i32
    return %c0_i32, %c0_i32_0 : i32, i32
  }
  func.func @transform_4(%arg0: i32, %arg1: i32) -> (i32, i32) {
    %c0_i32 = arith.constant 0 : i32
    %c0_i32_0 = arith.constant 0 : i32
    %c0_i32_1 = arith.constant 0 : i32
    return %c0_i32, %c0_i32_0 : i32, i32
  }
  func.func @transform_5(%arg0: i32, %arg1: i32) -> (i32, i32, i32) {
    %c0_i32 = arith.constant 0 : i32
    %c0_i32_0 = arith.constant 0 : i32
    return %arg0, %arg1, %c0_i32 : i32, i32, i32
  }
}

</mosaic_0001>

<bundles_post_ra>
// kernel: tpu_custom_call.1
= control target key start
LH: loop header
LB: loop body
LE: loop exit
PB: predicated region body
PF: predicated region fallthrough
CT: control target
= control target key end

     0   :  { %10 = vsyncpa [#allocation5], 0  ;;  %s1389_s0 = inlined_call_operand.hbm [shape: bf16[2,8,32], index: 0, kind: input, shape index: {}]   ;;  %s1390_s1 = inlined_call_operand.hbm [shape: bf16[32,96], index: 1, kind: input, shape index: {}]   ;;  %s1391_s2 = inlined_call_operand.vmem [shape: f32[1,96], index: 2, kind: input, shape index: {}]   ;;  %s1392_s3 = inlined_call_operand.hbm [shape: bf16[32,32], index: 3, kind: input, shape index: {}]   ;;  %s1393_s4 = inlined_call_operand.vmem [shape: f32[1,32], index: 4, kind: input, shape index: {}]   ;;  %s1394_s5 = inlined_call_operand.hbm [shape: f32[2,8,32], index: 5, kind: output, shape index: {}]  }
   0x1   :  { %12 = vsyncpa [#allocation5 + $0x1], 0 }
   0x2   :  { %13 = vsyncpa [#allocation8], 0 }
   0x3   :  { %14 = vsyncpa [#allocation6], 0 }
   0x4   :  { %16 = vsyncpa [#allocation6 + $0x1], 0  ;;  %s1199_s18 = smov 0   ;;  %s1201_s19 = smov 0  }
   0x5   :  { %s1203_s20 = smov 0   ;;  %s1205_s21 = smov 0  }
   0x6   :  { %s1207_s22 = smov 0   ;;  %s1209_s23 = smov 0  }
   0x7 LB: > { %s805_s24 = sadd.s32 4294967295, %s1153_s23   ;;  %p807_p0 = scmp.ge.s32.totalorder %s1153_s23, 1  ;;  %s1153_s23 = sphi %s1209_s23, %s22_s23   ;;  %s1149_s22 = sphi %s1207_s22, %s1404_s22   ;;  %s1145_s21 = sphi %s1205_s21, %s1403_s21   ;;  %s1141_s20 = sphi %s1203_s20, %s1402_s20   ;;  %s1137_s19 = sphi %s1201_s19, %s1401_s19   ;;  %s1133_s18 = sphi %s1199_s18, %s1400_s18  }
   0x8   : > { %p1233_p1 = scmp.eq.s32.totalorder %s805_s24, 0  ;;  %p177_p2 = scmp.lt.s32.totalorder %s1153_s23, 3 }
   0x9   : > { %s188_s28 = sshll.u32 %s1390_s1, 4  ;;  %s1155_s30 = smov [#allocation7]   ;;  %s189_s28 = int_to_ptr.hbm [resolvable:$true] %s188_s28 }
   0xa   : > { %p1241_p3 = pnand %p807_p0, %p177_p2  ;;  %s190_s6 = sshll.u32 %s1155_s30, 4  ;;  %s191_s6 = int_to_ptr.vmem [resolvable:$true] %s190_s6 }
   0xb   : > { %p810_p6 = scmp.ge.s32.totalorder %s1153_s23, 2  ;;  %s205_s9 = sshll.u32 %s1392_s3, 4  ;;  %s206_s9 = int_to_ptr.hbm [resolvable:$true] %s205_s9 }
   0xc   : > { %p875_p4 = pneg %p1241_p3  ;;  %s1156_s10 = smov 64  }
   0xd   : > { %s1157_s11 = smov 4   ;;  %s1158_s12 = smov [#allocation9]  }
   0xe   : > { %p876_p5 = pnand %p875_p4, %p1233_p1  ;;  %s207_s13 = sshll.u32 %s1158_s12, 4  ;;  %s208_s13 = int_to_ptr.vmem [resolvable:$true] %s207_s13 }
   0xf   : > { %s34_s14 = sadd.s32 1, %s1149_s22  ;;  %s806_s15 = sadd.s32 4294967294, %s1153_s23  }
  0x10   : > { %878 = dma.hbm_to_vmem [thread:$0]  (!%p876_p5), %s189_s28, 256, %s191_s6, [#allocation8], %s1156_s10, %s1156_s10, %s1157_s11  }
  0x11   : > { %881 = dma.hbm_to_vmem [thread:$0]  (!%p876_p5), %s206_s9, 256, %s208_s13, [#allocation8], %s1156_s10, %s1156_s10, %s1157_s11  }
  0x12   : > { %p36_p7 = scmp.ge.s32.totalorder %s34_s14, 2  ;;  %s41_s16 = sadd.s32 1, %s1141_s20 }
  0x13   : > { %p48_p8 = scmp.ne.s32.totalorder %s1141_s20, %s1137_s19  ;;  %p49_p9 = scmp.eq.s32.totalorder %s1153_s23, 0 }
  0x14   : > { %s1406_s14 = smov (%p36_p7, %s34_s14), 0  ;;  %p54_p10 = scmp.ne.s32.totalorder %s1137_s19, %s1133_s18 }
  0x15   : > { %s38_s17 = ssub.s32 %s1149_s22, %s1406_s14  ;;  %p164_p11 = scmp.eq.s32.totalorder %s805_s24, 1 }
  0x16   : > { %p39_p12 = scmp.eq.s32.totalorder %s38_s17, 0  ;;  %p1269_p13 = por %p1233_p1, %p54_p10 }
  0x17   : > { %p1273_p0 = por %p164_p11, %p48_p8  ;;  %p170_p2 = scmp.eq.s32.totalorder %s806_s15, 1 }
  0x18   : > { %s1278_s28 = scalar_select %p39_p12, %s1141_s20, %s41_s16  }
  0x19   : > { %p50_p4 = por %p49_p9, %p48_p8  ;;  %p1280_p5 = por %p170_p2, %p54_p10 }
  0x1a   : > { %s224_s6 = sand.u32 1, %s1141_s20   ;;  %s812_s24 = sshll.u32 %s1149_s22, 2 }
  0x1b   : > { %p892_p7 = scmp.lt.s32.totalorder %s1153_s23, 2  ;;  %s811_s7 = sshll.u32 %s224_s6, 2 }
  0x1c   : > { %s232_s10 = scalar_lea.hbm %s1389_s0, %s812_s24  ;;  %s228_s12 = scalar_lea.vmem [#allocation4], %s811_s7 }
  0x1d   : > { %s234_s11 = sshll.u32 %s232_s10, 4  ;;  %s236_s13 = sshll.u32 %s228_s12, 4  ;;  %s235_s11 = int_to_ptr.hbm [resolvable:$true] %s234_s11  ;;  %s237_s13 = int_to_ptr.vmem [resolvable:$true] %s236_s13 }
  0x1e   : > { %p883_p11 = pnand %p892_p7, %p50_p4  ;;  %s225_s15 = scalar_lea.sflag [#allocation5], %s224_s6 }
  0x1f   : > { %245 = sbr.rel (%p1241_p3) target bundleno = 1231 (0x4cf), region = 40  ;;  %s1293_s16 = sand.u32 (!%p1241_p3), 1, %s1137_s19  }
  0x20   : > { %885 = dma.hbm_to_vmem [thread:$0]  (!%p883_p11), %s235_s11, 64, %s237_s13, %s225_s15  }
  0x21   : > { %s814_s17 = sshll.u32 (!%p1241_p3), %s1293_s16, 2  ;;  %s248_s8 = scalar_lea.sflag (!%p1241_p3), [#allocation5], %s1293_s16 }
  0x22   : > { %s251_s24 = scalar_lea.vmem (!%p1241_p3), [#allocation4], %s814_s17 }
  0x24   : > { %1120 = dma.done.wait (%p1269_p13), %s248_s8, 64  }
  0x25   : > { %1122 = vsyncadd (%p1269_p13), %s248_s8, 4294967232 }
  0x26   : > { %1124 = dma.done.wait (%p1233_p1), [#allocation8], 512  }
  0x27   : > { %1126 = vsyncadd (%p1233_p1), [#allocation8], 4294966784  ;;  %v858_v0 = vld [vmem:[#allocation7 + $0x8] sm:$0xff]  ;;  %s1159_s29 = smov 96   ;;  %v857_v1 = vld [vmem:[#allocation7] sm:$0xff]  ;;  %vm321_vm0 = vcmask 261120  }
  0x28   : > { %314 = vrot.lane.b32.xlu0 %v858_v0, %s1159_s29  ;;  %v860_v2 = vld [vmem:[#allocation7 + $0x8] sm:$0xff]  ;;  %v859_v3 = vld [vmem:[#allocation7] sm:$0xff]  ;;  %v346_v4 = vld [vmem:[%s251_s24] sm:$0xf]  ;;  %s1160_s9 = smov 120   ;;  %vm339_vm1 = vcmask 519168  }
  0x29   : > { %377 = vmatpush.bf16.msra.mxu1 %v860_v2  ;;  %v958_v5 = vld [vmem:[%s1391_s2] ss:$0 sm:$0xff]  ;;  %v294_v8 = vld [vmem:[%s251_s24] sm:$0xf]  ;;  %vm386_vm2 = vcmask 64512   ;;  %s1161_s10 = smov 104  }
  0x2a   : > { %318 = vrot.lane.b32.xlu1 %v958_v5, %s1159_s29  ;;  %v959_v9 = vld [vmem:[%s1391_s2] ss:$0 sm:$0xff]  ;;  %s1162_s11 = smov 112   ;;  %vm424_vm3 = vcmask 1043456   ;;  %s1163_s12 = smov 88   ;;  %vm444_vm4 = vcmask 60416  }
  0x2b   : > { %s1164_s13 = smov 80   ;;  %s1165_s15 = smov 72   ;;  %vm514_vm5 = vcmask 126016   ;;  %vm581_vm6 = vcmask 191616   ;;  %vm648_vm7 = vcmask 257216  }
  0x2c   : > { %s1166_s17 = smov 16   ;;  %s1167_s8 = smov 8  }
  0x2d   : > { %378 = vmatpush.bf16.msra.mxu1 %v859_v3  ;;  %s1168_s24 = smov 24   ;;  %s817_s26 = sshll.u32 %s1293_s16, 3 }
  0x30   : > { %312 = vrot.lane.b32.xlu0 %v857_v1, %s1159_s29  ;;  %835 = vmatmul.msk.bf16.vlgmr.msra.gmra.mxu1 %vm321_vm0, %v346_v4 }
  0x9a   : > { %v315_v6 = vpop.permute.xlu0 %314 }
  0x9b   : > { %331 = vmatpush.bf16.msra.mxu0 %v315_v6 }
  0x9c   : > { %v319_v16 = vpop.permute.xlu1 %318 }
  0xa2   : > { %v313_v7 = vpop.permute.xlu0 %312 }
  0xa3   : > { %332 = vmatpush.bf16.msra.mxu0 %v313_v7 }
  0xa6   : > { %826 = vmatmul.msk.bf16.vlgmr.msra.gmra.mxu0 %vm321_vm0, %v294_v8 }
  0xad   : > { %v380_v10 = vpop.f32.mrf.mxu1 }
  0xae   : > { %v381_v11 = vadd.f32 %v959_v9, %v380_v10 }
  0xb0   : > { %v384_v12 = vpack.c.bf16 %v381_v11, %v381_v11 }
  0xb2   : > { %v448_v13 = vunpack.c.l.b16 %v384_v12 }
  0xb4   : > { %v449_v14 = vpack.c.b16 %v448_v13, %v448_v13 }
  0xb5   : > { %v382_v15 = vpop.f32.mrf.mxu1 }
  0xb6   : > { %450 = vrot.lane.b32.xlu0 %v449_v14, %s1160_s9 }
 0x123   : > { %v334_v17 = vpop.f32.mrf.mxu0 }
 0x124   : > { %v335_v18 = vadd.f32 %v334_v17, %v319_v16 }
 0x126   : > { %v338_v19 = vpack.c.bf16 %v335_v18, %v335_v18 }
 0x128   : > { %340 = vst.msk [vmem:[#allocation2] sm:$0xf] %vm339_vm1, %v338_v19  ;;  %v451_v48 = vpop.permute.xlu0 %450 }
 0x12b   : > { %v336_v20 = vpop.f32.mrf.mxu0 }
 0x12f   : > { %v385_v21 = vld [vmem:[#allocation2] sm:$0xf] }
 0x130   : > { %v583_v22 = vld [vmem:[#allocation2] sm:$0xf]  ;;  %v391_v23 = vsel %vm386_vm2, %v385_v21, 0  ;;  %v417_v24 = vunpack.c.l.b16 %v385_v21 }
 0x131   : > { %v587_v25 = vunpack.c.l.b16 %v583_v22  ;;  %400 = vmatpush.bf16.xpose.msra.mxu2 %v391_v23  ;;  %v446_v28 = vld [vmem:[#allocation2] sm:$0xf] }
 0x132   : > { %v418_v27 = vpack.c.b16 %v417_v24, %v417_v24  ;;  %v453_v29 = vunpack.c.l.b16 %v446_v28  ;;  %v516_v31 = vld [vmem:[#allocation2] sm:$0xf] }
 0x133   : > { %v1317_v26 = vpack.c.b16 %v587_v25, %v587_v25  ;;  %v520_v32 = vunpack.c.l.b16 %v516_v31 }
 0x134   : > { %419 = vrot.lane.b32.xlu2 %v418_v27, %s1159_s29  ;;  %v454_v30 = vpack.c.b16 %v453_v29, %v453_v29  ;;  %s854_s29 = sshll.u32 %s1145_s21, 3  ;;  %s689_s21 = scalar_lea.sflag [#allocation6], %s1293_s16 }
 0x135   : > { %589 = vrot.lane.b32.xlu0 %v1317_v26, %s1161_s10  ;;  %v521_v33 = vpack.c.b16 %v520_v32, %v520_v32  ;;  %s700_s7 = scalar_lea.hbm %s1394_s5, %s854_s29  ;;  %s1087_s29 = scalar_lea.hbm %s1394_s5, 16 }
 0x138   : > { %836 = vmatmul.msk.bf16.vlgmr.msra.gmra.mxu2 %vm386_vm2, %v384_v12 }
 0x13c   : > { %455 = vrot.lane.b32.xlu2 %v454_v30, %s1160_s9 }
 0x13d   : > { %584 = vrot.lane.b32.xlu0 %v449_v14, %s1161_s10 }
 0x144   : > { %522 = vrot.lane.b32.xlu2 %v521_v33, %s1162_s11 }
 0x14c   : > { %517 = vrot.lane.b32.xlu2 %v449_v14, %s1162_s11  ;;  %s288_s11 = scalar_lea.vmem [#allocation10], %s817_s26 }
 0x18e   : > { %v420_v34 = vpop.permute.xlu2 %419 }
 0x18f   : > { %v426_v35 = vsel %vm424_vm3, %v420_v34, 0 }
 0x190   : > { %435 = vmatpush.bf16.msra.mxu3 %v426_v35 }
 0x196   : > { %v456_v36 = vpop.permute.xlu2 %455 }
 0x197   : > { %v461_v37 = vsel %vm386_vm2, %v456_v36, 0 }
 0x198   : > { %470 = vmatpush.bf16.xpose.msrb.mxu3 %v461_v37 }
 0x19e   : > { %v523_v38 = vpop.permute.xlu2 %522 }
 0x19f   : > { %v528_v39 = vsel %vm386_vm2, %v523_v38, 0 }
 0x1a0   : > { %537 = vmatpush.bf16.xpose.msrb.mxu1 %v528_v39 }
 0x1a6   : > { %v518_v40 = vpop.permute.xlu2 %517 }
 0x1a7   : > { %840 = vmatmul.msk.bf16.vlgmr.msrb.gmra.mxu1 %vm386_vm2, %v518_v40  ;;  %v590_v52 = vpop.permute.xlu0 %589 }
 0x1a8   : > { %v595_v54 = vsel %vm386_vm2, %v590_v52, 0 }
 0x1af   : > { %v585_v59 = vpop.permute.xlu0 %584 }
 0x1bb   : > { %v402_v41 = vpop.f32.mrf.mxu2 }
 0x1bc   : > { %v406_v42 = vsel %vm386_vm2, %v402_v41, -inf }
 0x1bd   : > { %407 = vmax.xlane.f32.xlu1 %v406_v42 }
 0x1c3   : > { %v404_v43 = vpop.f32.mrf.mxu2 }
 0x1d6   : > { %486 = vrot.lane.b32.xlu1 %v454_v30, %s1163_s12  ;;  %s702_s12 = sshll.u32 %s288_s11, 4  ;;  %s703_s12 = int_to_ptr.vmem [resolvable:$true] %s702_s12 }
 0x1de   : > { %553 = vrot.lane.b32.xlu1 %v521_v33, %s1164_s13  ;;  %s704_s13 = sshll.u32 %s700_s7, 4  ;;  %s705_s13 = int_to_ptr.hbm [resolvable:$true] %s704_s13 }
 0x224   : > { %v539_v44 = vpop.f32.mrf.mxu1 }
 0x225   : > { %v543_v45 = vsel %vm386_vm2, %v539_v44, -inf }
 0x226   : > { %544 = vmax.xlane.f32.xlu0 %v543_v45 }
 0x22c   : > { %v541_v46 = vpop.f32.mrf.mxu1 }
 0x230   : > { %v408_v47 = vpop.xlane.xlu1 %407 }
 0x231   : > { %v409_v49 = vsub.f32 %v402_v41, %v408_v47  ;;  %v862_v47 = vld [vmem:[#allocation9 + $0x8] sm:$0xff] }
 0x232   : > { %680 = vmatpush.bf16.msra.mxu1 %v862_v47 }
 0x233   : > { %v410_v50 = vmul.f32 1.442695, %v409_v49 }
 0x235   : > { %961 = vpow2.f32 %v410_v50 }
 0x23b   : > { %v962_v51 = vpop.eup %961 }
 0x23c   : > { %v415_v53 = vpack.c.bf16 %v962_v51, %v962_v51 }
 0x23e   : > { %837 = vmatmul.msk.bf16.vlgmr.msra.gmra.mxu3 %vm386_vm2, %v415_v53  ;;  %v960_v53 = vld [vmem:[%s1393_s4] ss:$0 sm:$0xff] }
 0x23f   : > { %604 = vmatpush.bf16.xpose.msra.mxu3 %v595_v54 }
 0x248   : > { %v487_v55 = vpop.permute.xlu1 %486 }
 0x249   : > { %v492_v56 = vsel %vm424_vm3, %v487_v55, 0 }
 0x24a   : > { %501 = vmatpush.bf16.msrb.mxu0 %v492_v56 }
 0x24e   : > { %838 = vmatmul.msk.bf16.vlgmr.msrb.gmra.mxu3 %vm386_vm2, %v451_v48  ;;  %v861_v48 = vld [vmem:[#allocation9] sm:$0xff] }
 0x24f   : > { %681 = vmatpush.bf16.msra.mxu1 %v861_v48 }
 0x250   : > { %v554_v57 = vpop.permute.xlu1 %553 }
 0x251   : > { %v559_v58 = vsel %vm424_vm3, %v554_v57, 0 }
 0x252   : > { %568 = vmatpush.bf16.msrb.mxu2 %v559_v58 }
 0x25e   : > { %842 = vmatmul.msk.bf16.vlgmr.msra.gmra.mxu3 %vm386_vm2, %v585_v59 }
 0x299   : > { %v545_v60 = vpop.xlane.xlu0 %544 }
 0x29a   : > { %v546_v61 = vsub.f32 %v539_v44, %v545_v60 }
 0x29c   : > { %v547_v62 = vmul.f32 1.442695, %v546_v61 }
 0x29e   : > { %963 = vpow2.f32 %v547_v62 }
 0x2a4   : > { %v964_v63 = vpop.eup %963 }
 0x2a5   : > { %v549_v0 = vsel %vm386_vm2, %v964_v63, 0.0  ;;  %v552_v1 = vpack.c.bf16 %v964_v63, %v964_v63 }
 0x2a6   : > { %550 = vadd.xlane.f32.xlu1 %v549_v0 }
 0x2a7   : > { %841 = vmatmul.msk.bf16.vlgmr.msrb.gmra.mxu2 %vm386_vm2, %v552_v1 }
 0x2c1   : > { %v437_v2 = vpop.f32.mrf.mxu3 }
 0x2c9   : > { %v439_v3 = vpop.f32.mrf.mxu3 }
 0x2d1   : > { %v472_v4 = vpop.f32.mrf.mxu3 }
 0x2d2   : > { %v476_v5 = vsel %vm386_vm2, %v472_v4, -inf }
 0x2d3   : > { %477 = vmax.xlane.f32.xlu2 %v476_v5 }
 0x2d9   : > { %v474_v6 = vpop.f32.mrf.mxu3 }
 0x2e1   : > { %v606_v7 = vpop.f32.mrf.mxu3 }
 0x2e2   : > { %v610_v8 = vsel %vm386_vm2, %v606_v7, -inf }
 0x2e3   : > { %611 = vmax.xlane.f32.xlu2 %v610_v8 }
 0x2e9   : > { %v608_v9 = vpop.f32.mrf.mxu3 }
 0x2fb   : > { %620 = vrot.lane.b32.xlu2 %v1317_v26, %s1165_s15  ;;  %v412_v26 = vsel %vm386_vm2, %v962_v51, 0.0  ;;  %s1081_s15 = sshra.s32 %s705_s13, 4  ;;  %s1082_s15 = int_to_ptr.hbm [resolvable:$true] %s1081_s15 }
 0x2fc   : > { %p1088_p9 = scmp.lt.s32.totalorder %s1082_s15, %s1394_s5 }
 0x319   : > { %v551_v27 = vpop.xlane.xlu1 %550 }
 0x32a   : > { %v570_v10 = vpop.f32.mrf.mxu2 }
 0x332   : > { %v572_v11 = vpop.f32.mrf.mxu2 }
 0x346   : > { %v478_v12 = vpop.xlane.xlu2 %477 }
 0x347   : > { %v479_v13 = vsub.f32 %v472_v4, %v478_v12 }
 0x349   : > { %v480_v14 = vmul.f32 1.442695, %v479_v13 }
 0x34b   : > { %965 = vpow2.f32 %v480_v14 }
 0x351   : > { %v966_v15 = vpop.eup %965 }
 0x352   : > { %v482_v16 = vsel %vm386_vm2, %v966_v15, 0.0  ;;  %v485_v17 = vpack.c.bf16 %v966_v15, %v966_v15 }
 0x353   : > { %483 = vadd.xlane.f32.xlu0 %v482_v16 }
 0x354   : > { %839 = vmatmul.msk.bf16.vlgmr.msrb.gmra.mxu0 %vm386_vm2, %v485_v17 }
 0x356   : > { %v612_v18 = vpop.xlane.xlu2 %611 }
 0x357   : > { %v613_v19 = vsub.f32 %v606_v7, %v612_v18 }
 0x359   : > { %v614_v20 = vmul.f32 1.442695, %v613_v19 }
 0x35b   : > { %967 = vpow2.f32 %v614_v20 }
 0x35c   : > { %969 = vrcp.f32 %v551_v27 }
 0x35e   : > { %v621_v21 = vpop.permute.xlu2 %620 }
 0x35f   : > { %v626_v22 = vsel %vm424_vm3, %v621_v21, 0 }
 0x360   : > { %635 = vmatpush.bf16.msra.mxu0 %v626_v22 }
 0x361   : > { %v968_v23 = vpop.eup %967 }
 0x362   : > { %v619_v24 = vpack.c.bf16 %v968_v23, %v968_v23  ;;  %v616_v25 = vsel %vm386_vm2, %v968_v23, 0.0  ;;  %v970_v28 = vpop.eup %969 }
 0x363   : > { %617 = vadd.xlane.f32.xlu0 %v616_v25  ;;  %v575_v29 = vmul.f32 %v970_v28, %v570_v10 }
 0x364   : > { %843 = vmatmul.msk.bf16.vlgmr.msra.gmra.mxu0 %vm386_vm2, %v619_v24 }
 0x365   : > { %v576_v30 = vpack.c.bf16 %v575_v29, %v575_v29 }
 0x36b   : > { %413 = vadd.xlane.f32.xlu0 %v412_v26 }
 0x37f   : > { %578 = vrot.lane.b32.xlu0 %v576_v30, %s1166_s17  ;;  %s1083_s17 = scalar_lea.hbm %s1082_s15, 8 }
 0x380   : > { %p1084_p1 = scmp.ne.s32.totalorder %s1082_s15, %s1083_s17  ;;  %p1089_p10 = scmp.lt.s32.totalorder %s1087_s29, %s1083_s17 }
 0x382   : > { %p1085_p3 = pnand %p1084_p1, %p1273_p0  ;;  %p1090_p12 = por %p1089_p10, %p1088_p9 }
 0x384   : > { %p1086_p8 = pneg %p1085_p3 }
 0x386   : > { %p1091_p13 = pnand %p1090_p12, %p1086_p8 }
 0x3c6   : > { %v484_v31 = vpop.xlane.xlu0 %483 }
 0x3c7   : > { %971 = vrcp.f32 %v484_v31 }
 0x3cd   : > { %v972_v32 = vpop.eup %971 }
 0x3d1   : > { %v503_v33 = vpop.f32.mrf.mxu0 }
 0x3d2   : > { %v508_v34 = vmul.f32 %v972_v32, %v503_v33 }
 0x3d4   : > { %v509_v35 = vpack.c.bf16 %v508_v34, %v508_v34 }
 0x3d6   : > { %v618_v36 = vpop.xlane.xlu0 %617  ;;  %511 = vrot.lane.b32.xlu2 %v509_v35, %s1167_s8 }
 0x3d7   : > { %973 = vrcp.f32 %v618_v36 }
 0x3d9   : > { %v505_v37 = vpop.f32.mrf.mxu0 }
 0x3dd   : > { %v974_v39 = vpop.eup %973 }
 0x3de   : > { %v414_v38 = vpop.xlane.xlu0 %413 }
 0x3df   : > { %975 = vrcp.f32 %v414_v38 }
 0x3e1   : > { %v637_v40 = vpop.f32.mrf.mxu0 }
 0x3e2   : > { %v642_v41 = vmul.f32 %v974_v39, %v637_v40 }
 0x3e4   : > { %v643_v42 = vpack.c.bf16 %v642_v41, %v642_v41 }
 0x3e5   : > { %v976_v43 = vpop.eup %975 }
 0x3e6   : > { %v442_v44 = vmul.f32 %v976_v43, %v437_v2  ;;  %645 = vrot.lane.b32.xlu2 %v643_v42, %s1168_s24 }
 0x3e8   : > { %v443_v45 = vpack.c.bf16 %v442_v44, %v442_v44 }
 0x3e9   : > { %v639_v46 = vpop.f32.mrf.mxu0 }
 0x3ea   : > { %445 = vst.msk [vmem:[#allocation3] sm:$0xf] %vm444_vm4, %v443_v45 }
 0x3f1   : > { %v579_v50 = vpop.permute.xlu0 %578 }
 0x430   : > { %v512_v49 = vpop.permute.xlu2 %511 }
 0x431   : > { %515 = vst.msk [vmem:[#allocation3] sm:$0xf] %vm514_vm5, %v512_v49 }
 0x432   : > { %582 = vst.msk [vmem:[#allocation3] sm:$0xf] %vm581_vm6, %v579_v50 }
 0x440   : > { %v646_v51 = vpop.permute.xlu2 %645 }
 0x441   : > { %649 = vst.msk [vmem:[#allocation3] sm:$0xf] %vm648_vm7, %v646_v51 }
 0x448   : > { %v650_v52 = vld [vmem:[#allocation3] sm:$0xf] }
 0x449   : > { %852 = vmatmul.msk.bf16.vlgmr.msra.gmra.mxu1 %vm321_vm0, %v650_v52 }
 0x4c6   : > { %v683_v54 = vpop.f32.mrf.mxu1 }
 0x4c7   : > { %v684_v55 = vadd.f32 %v960_v53, %v683_v54 }
 0x4c9   : > { %687 = vst.msk [vmem:[%s288_s11] sm:$0xff] %vm321_vm0, %v684_v55 }
 0x4ca   : > { %1094 = shalt.err (!%p1091_p13)
}
 0x4cb   : > { %873 = dma.vmem_to_hbm [thread:$0]  (%p1273_p0), %s703_s12, 128, %s705_s13, %s689_s21  }
 0x4ce   : > { %v685_v56 = vpop.f32.mrf.mxu1 }
 0x4cf PF: > { %s716_s16 = sand.u32 1, %s1133_s18   ;;  %p887_p2 = pnand %p810_p6, %p1280_p5 }
 0x4d0   : > { %s717_s25 = scalar_lea.sflag [#allocation6], %s716_s16 }
 0x4d1   : > { %p888_p4 = pneg %p887_p2 }
 0x4d3   : > { %1128 = dma.done.wait (%p888_p4), %s717_s25, 128  }
 0x4d4   : > { %1130 = vsyncadd (%p888_p4), %s717_s25, 4294967168  ;;  %s22_s23 = sadd.s32 1, %s1153_s23   ;;  %s1400_s18 = smov %s1137_s19 }
 0x4d5   : > { %p19_p7 = scmp.ge.s32.totalorder %s22_s23, 4   ;;  %s1401_s19 = smov %s1141_s20 }
 0x4d6   : > { %s1402_s20 = smov %s1278_s28  ;;  %s1403_s21 = smov %s1149_s22 }
 0x4d7   : > { %s1404_s22 = smov %s1406_s14  ;;  %21 = sbr.rel (!%p19_p7) target bundleno = 7 (0x7), region = 98 }
 0x4dc   :  { %723 = vsyncpa [#allocation5], 1 }
 0x4dd   :  { %725 = vsyncpa [#allocation5 + $0x1], 1 }
 0x4de   :  { %726 = vsyncpa [#allocation8], 1 }
 0x4df   :  { %727 = vsyncpa [#allocation6], 1 }
 0x4e0   :  { %729 = vsyncpa [#allocation6 + $0x1], 1 }

</bundles_post_ra>
